<compile_context>
chip_gen: v7x
topology: tpu7x:2x2x1
jax: 0.10.0
libtpu: 0.0.40
codegen_flags: <defaults>
</compile_context>

<pallas_src>
import jax
import jax.numpy as jnp
from jax.experimental import pallas as pl
from jax.experimental.pallas import tpu as pltpu


def _round_up(x, m):
    return (x + m - 1) // m * m


def _largest_divisor_tile(total, unit, cap):
    """Largest multiple of `unit` that divides `total` and is <= cap, else `total`."""
    cap = min(cap, total)
    t = cap - (cap % unit)
    while t >= unit:
        if total % t == 0:
            return t
        t -= unit
    return total


def _head_kernel(x_ref, w_ref, b_ref, o_ref, acc_ref):
    # x_ref:   (tb, C, thw) features, native dtype, spatial on lanes
    # w_ref:   (C, Npad) f32, pre-scaled by 1/(H*W)  (mean folded into weight)
    # b_ref:   (1, Npad) f32
    # o_ref:   (tb, Npad) f32
    # acc_ref: (tb, C) f32 running spatial sum (persists across HW grid steps)
    hw_id = pl.program_id(1)

    @pl.when(hw_id == 0)
    def _():
        acc_ref[...] = jnp.zeros_like(acc_ref)

    # Partial spatial sum: lane reduce on the XLU, accumulated in f32.
    acc_ref[...] += jnp.sum(x_ref[...].astype(jnp.float32), axis=-1)

    @pl.when(hw_id == pl.num_programs(1) - 1)
    def _():
        # pooled_mean @ W^T + b  ==  pooled_sum @ (W^T / HW) + b
        y = jnp.dot(acc_ref[...], w_ref[...], preferred_element_type=jnp.float32)
        o_ref[...] = y + b_ref[...]


def classification_head(x_nchw, weight, bias, *, hw_tile=None, batch_tile=None):
    """Fused AdaptiveAvgPool2d(1) + flatten + Linear.

    x_nchw: (B, C, H, W) features (any float dtype; bf16 inputs halve HBM traffic,
            accumulation stays in f32).
    weight: (n_classes, C); bias: (n_classes,)
    """
    B, C, H, W = x_nchw.shape
    HW = H * W
    N = weight.shape[0]
    Np = _round_up(N, 128)  # lane-dense output => unmasked stores

    # NCHW -> (B, C, HW): free reshape, no materialized transpose.
    x = x_nchw.reshape(B, C, HW)

    # Fold the 1/(H*W) mean scale into the tiny weight; pad classes to lane width.
    w = jnp.transpose(weight, (1, 0)).astype(jnp.float32) * jnp.float32(1.0 / HW)
    w = jnp.pad(w, ((0, 0), (0, Np - N)))
    b = jnp.pad(bias.astype(jnp.float32), (0, Np - N)).reshape(1, Np)

    # --- tile sizing (kept well under v7x's 64 MiB VMEM / 32 MiB scoped budget) ---
    if batch_tile is None:
        batch_tile = B if B <= 8 else _largest_divisor_tile(B, 8, 8)
    tb = batch_tile

    itemsize = jnp.dtype(x.dtype).itemsize
    if hw_tile is None:
        budget = 4 * 1024 * 1024  # per input buffer (pipeline double-buffers it)
        cap = max(128, budget // max(1, tb * C * itemsize))
        hw_tile = _largest_divisor_tile(HW, 128, cap)
    thw = hw_tile

    grid = (B // tb, HW // thw)  # batch parallel (2 TCs on v7x), HW is the reduction

    out = pl.pallas_call(
        _head_kernel,
        out_shape=jax.ShapeDtypeStruct((B, Np), jnp.float32),
        grid=grid,
        in_specs=[
            pl.BlockSpec((tb, C, thw), lambda i, j: (i, 0, j)),
            pl.BlockSpec((C, Np), lambda i, j: (0, 0)),
            pl.BlockSpec((1, Np), lambda i, j: (0, 0)),
        ],
        out_specs=pl.BlockSpec((tb, Np), lambda i, j: (i, 0)),
        scratch_shapes=[pltpu.VMEM((tb, C), jnp.float32)],
        compiler_params=pltpu.CompilerParams(
            dimension_semantics=("parallel", "arbitrary"),
            vmem_limit_bytes=32 * 1024 * 1024,
        ),
    )(x, w, b)

    # Drop the lane padding.
    return out[:, :N]


if __name__ == "__main__":
    key = jax.random.PRNGKey(0)
    k_x, k_w, k_b = jax.random.split(key, 3)

    # Small shapes: batch=2, channels=32, spatial=16x16, n_classes=10.
    B, C, H, W = 2, 32, 16, 16
    n_classes = 10

    x = jax.random.normal(k_x, (B, C, H, W), dtype=jnp.float32)

    bound = 1.0 / jnp.sqrt(jnp.float32(C))
    weight = jax.random.uniform(
        k_w, (n_classes, C), minval=-bound, maxval=bound, dtype=jnp.float32
    )
    bias = jax.random.uniform(
        k_b, (n_classes,), minval=-bound, maxval=bound, dtype=jnp.float32
    )

    # hw_tile=128 forces two grid steps along the spatial axis so the
    # accumulated-sum (multi-block) path is exercised; default sizing picks
    # the largest HW tile that fits the VMEM budget.
    out = classification_head(x, weight, bias, hw_tile=128)
    out = jax.block_until_ready(out)

    # Pure-JAX reference: AdaptiveAvgPool2d(1) + flatten + Linear.
    pooled_ref = jnp.mean(x, axis=(2, 3))
    ref = pooled_ref @ weight.T + bias
    assert out.shape == (B, n_classes)
    assert jnp.allclose(out, ref, atol=1e-4, rtol=1e-5), "mismatch vs reference"

    print("KERNEL_OK")
</pallas_src>

<mosaic_0001>
module attributes {stable_mosaic.version = 11 : i64} {
  func.func @_head_kernel(%arg0: i32, %arg1: i32, %arg2: memref<2x32x128xf32, #tpu.memory_space<vmem>>, %arg3: memref<32x128xf32, #tpu.memory_space<vmem>>, %arg4: memref<1x128xf32, #tpu.memory_space<vmem>>, %arg5: memref<2x128xf32, #tpu.memory_space<vmem>>, %arg6: memref<2x32xf32, #tpu.memory_space<vmem>>) attributes {dimension_semantics = [#tpu.dimension_semantics<parallel>, #tpu.dimension_semantics<arbitrary>], iteration_bounds = array<i64: 1, 2>, scalar_prefetch = 0 : i64, scratch_operands = 1 : i64, tpu.core_type = #tpu.core_type<tc>, window_params = [{transform_indices = @transform_0, window_bounds = array<i64: 2, 32, 128>}, {pipeline_mode = #tpu.pipeline_mode<synchronous>, transform_indices = @transform_1, window_bounds = array<i64: 32, 128>}, {pipeline_mode = #tpu.pipeline_mode<synchronous>, transform_indices = @transform_2, window_bounds = array<i64: 1, 128>}, {transform_indices = @transform_3, window_bounds = array<i64: 2, 128>}]} {
    %c0_i32 = arith.constant 0 : i32
    %0 = arith.cmpi eq, %arg1, %c0_i32 : i32
    %1 = arith.extui %0 : i1 to i32
    %c0_i32_0 = arith.constant 0 : i32
    %2 = arith.cmpi ne, %1, %c0_i32_0 : i32
    scf.if %2 {
      %cst_8 = arith.constant 0.000000e+00 : f32
      %11 = vector.broadcast %cst_8 : f32 to vector<2x32xf32>
      %c0_9 = arith.constant 0 : index
      %c0_10 = arith.constant 0 : index
      %12 = vector.load %arg6[%c0_9, %c0_10] : memref<2x32xf32, #tpu.memory_space<vmem>>, vector<2x32xf32>
      tpu.vector_store %arg6[%c0_9, %c0_10], %11 {strides = array<i32>} : memref<2x32xf32, #tpu.memory_space<vmem>>, vector<2x32xf32>,
    } else {
    }
    %c0 = arith.constant 0 : index
    %c0_1 = arith.constant 0 : index
    %3 = vector.load %arg6[%c0, %c0_1] : memref<2x32xf32, #tpu.memory_space<vmem>>, vector<2x32xf32>
    %c0_2 = arith.constant 0 : index
    %c0_3 = arith.constant 0 : index
    %c0_4 = arith.constant 0 : index
    %4 = vector.load %arg2[%c0_2, %c0_3, %c0_4] : memref<2x32x128xf32, #tpu.memory_space<vmem>>, vector<2x32x128xf32>
    %cst = arith.constant dense<0.000000e+00> : vector<2x32xf32>
    %5 = vector.multi_reduction <add>, %4, %cst [2] : vector<2x32x128xf32> to vector<2x32xf32>
    %6 = arith.addf %3, %5 : vector<2x32xf32>
    %c0_5 = arith.constant 0 : index
    %c0_6 = arith.constant 0 : index
    %7 = vector.load %arg6[%c0_5, %c0_6] : memref<2x32xf32, #tpu.memory_space<vmem>>, vector<2x32xf32>
    tpu.vector_store %arg6[%c0_5, %c0_6], %6 {strides = array<i32>} : memref<2x32xf32, #tpu.memory_space<vmem>>, vector<2x32xf32>,
    %c1_i32 = arith.constant 1 : i32
    %8 = arith.cmpi eq, %arg1, %c1_i32 : i32
    %9 = arith.extui %8 : i1 to i32
    %c0_i32_7 = arith.constant 0 : i32
    %10 = arith.cmpi ne, %9, %c0_i32_7 : i32
    scf.if %10 {
      %c0_8 = arith.constant 0 : index
      %c0_9 = arith.constant 0 : index
      %11 = vector.load %arg6[%c0_8, %c0_9] : memref<2x32xf32, #tpu.memory_space<vmem>>, vector<2x32xf32>
      %c0_10 = arith.constant 0 : index
      %c0_11 = arith.constant 0 : index
      %12 = vector.load %arg3[%c0_10, %c0_11] : memref<32x128xf32, #tpu.memory_space<vmem>>, vector<32x128xf32>
      %cst_12 = arith.constant dense<0.000000e+00> : vector<2x128xf32>
      %13 = tpu.matmul %11, %12, %cst_12 {dimension_numbers = #tpu.dot_dimension_numbers<[1], [0], [0], [1], [0, 0, 1, 1], [], []>} : vector<2x32xf32>, vector<32x128xf32>, vector<2x128xf32> -> vector<2x128xf32>
      %c0_13 = arith.constant 0 : index
      %c0_14 = arith.constant 0 : index
      %14 = vector.load %arg4[%c0_13, %c0_14] : memref<1x128xf32, #tpu.memory_space<vmem>>, vector<1x128xf32>
      %15 = vector.broadcast %14 : vector<1x128xf32> to vector<2x128xf32>
      %16 = arith.addf %13, %15 : vector<2x128xf32>
      %c0_15 = arith.constant 0 : index
      %c0_16 = arith.constant 0 : index
      %17 = vector.load %arg5[%c0_15, %c0_16] : memref<2x128xf32, #tpu.memory_space<vmem>>, vector<2x128xf32>
      tpu.vector_store %arg5[%c0_15, %c0_16], %16 {strides = array<i32>} : memref<2x128xf32, #tpu.memory_space<vmem>>, vector<2x128xf32>,
    } else {
    }
    return
  }
  func.func @transform_0(%arg0: i32, %arg1: i32) -> (i32, i32, i32) {
    %c0_i32 = arith.constant 0 : i32
    %c0_i32_0 = arith.constant 0 : i32
    return %arg0, %c0_i32, %arg1 : i32, i32, i32
  }
  func.func @transform_1(%arg0: i32, %arg1: i32) -> (i32, i32) {
    %c0_i32 = arith.constant 0 : i32
    %c0_i32_0 = arith.constant 0 : i32
    %c0_i32_1 = arith.constant 0 : i32
    return %c0_i32, %c0_i32_0 : i32, i32
  }
  func.func @transform_2(%arg0: i32, %arg1: i32) -> (i32, i32) {
    %c0_i32 = arith.constant 0 : i32
    %c0_i32_0 = arith.constant 0 : i32
    %c0_i32_1 = arith.constant 0 : i32
    return %c0_i32, %c0_i32_0 : i32, i32
  }
  func.func @transform_3(%arg0: i32, %arg1: i32) -> (i32, i32) {
    %c0_i32 = arith.constant 0 : i32
    %c0_i32_0 = arith.constant 0 : i32
    return %arg0, %c0_i32 : i32, i32
  }
}

</mosaic_0001>

<bundles_post_ra>
// kernel: tpu_custom_call.1
= control target key start
LH: loop header
LB: loop body
LE: loop exit
PB: predicated region body
PF: predicated region fallthrough
CT: control target
= control target key end

     0   :  { %8 = vsyncpa [#allocation4], 0  ;;  %s966_s0 = inlined_call_operand.hbm [shape: f32[2,32,256], index: 0, kind: input, shape index: {}]   ;;  %s967_s1 = inlined_call_operand.hbm [shape: f32[32,128], index: 1, kind: input, shape index: {}]   ;;  %s968_s2 = inlined_call_operand.vmem [shape: f32[1,128], index: 2, kind: input, shape index: {}]   ;;  %s969_s3 = inlined_call_operand.hbm [shape: f32[2,128], index: 3, kind: output, shape index: {}]  }
   0x1   :  { %10 = vsyncpa [#allocation4 + $0x1], 0 }
   0x2   :  { %11 = vsyncpa [#allocation7], 0 }
   0x3   :  { %12 = vsyncpa [#allocation5], 0  ;;  %s771_s12 = smov 0   ;;  %s773_s13 = smov 0  }
   0x4   :  { %s775_s14 = smov 0   ;;  %s777_s15 = smov 0  }
   0x5   :  { %s779_s16 = smov 0   ;;  %s781_s17 = smov 0  }
   0x6 LB: > { %s478_s18 = sadd.s32 4294967295, %s739_s17   ;;  %p46_p0 = scmp.ne.s32.totalorder %s727_s14, %s723_s13  ;;  %s739_s17 = sphi %s781_s17, %s18_s17   ;;  %s735_s16 = sphi %s779_s16, %s990_s16   ;;  %s731_s15 = sphi %s777_s15, %s989_s15   ;;  %s727_s14 = sphi %s775_s14, %s988_s14   ;;  %s723_s13 = sphi %s773_s13, %s987_s13   ;;  %s719_s12 = sphi %s771_s12, %s986_s12  }
   0x7   : > { %p47_p1 = scmp.eq.s32.totalorder %s739_s17, 0  ;;  %p52_p2 = scmp.ne.s32.totalorder %s723_s13, %s719_s12 }
   0x8   : > { %p806_p3 = scmp.eq.s32.totalorder %s478_s18, 0  ;;  %p479_p4 = scmp.ge.s32.totalorder %s739_s17, 1 }
   0x9   : > { %p48_p5 = por %p47_p1, %p46_p0  ;;  %p131_p6 = scmp.lt.s32.totalorder %s739_s17, 3 }
   0xa   : > { %s975_s19 = scalar_select %p806_p3, 1, 0 }
   0xb   : > { %p814_p7 = por %p806_p3, %p52_p2  ;;  %p818_p8 = pnand %p479_p4, %p131_p6 }
   0xc   : > { %s741_s22 = smov [#allocation6]   ;;  %p536_p11 = scmp.lt.s32.totalorder %s739_s17, 2 }
   0xd   : > { %s976_s20 = scalar_select %p814_p7, 1, 0 }
   0xe   : > { %s977_s21 = scalar_select %p818_p8, 1, 0 }
   0xf   : > { %s143_s23 = sshll.u32 %s741_s22, 4  ;;  %p527_p9 = pneg %p818_p8  ;;  %s144_s23 = int_to_ptr.vmem [resolvable:$true] %s143_s23 }
  0x10   : > { %s39_s25 = sadd.s32 1, %s727_s14  ;;  %p832_p12 = pnand %p536_p11, %p48_p5 }
  0x11   : > { %p826_p10 = pnand %p527_p9, %p806_p3  ;;  %s597_s29 = scalar_lea.hbm %s967_s1, 512 }
  0x12   : > { %s979_s26 = scalar_select %p832_p12, 1, 0 }
  0x13   : > { %p598_p13 = scmp.ne.s32.totalorder %s967_s1, %s597_s29  ;;  %p599_p0 = pneg %p826_p10 }
  0x14   : > { %p604_p4 = scmp.lt.u32.totalorder %s597_s29, %s967_s1 }
  0x15   : > { %p600_p1 = pnand %p599_p0, %p598_p13 }
  0x17   : > { %p601_p2 = pneg %p600_p1 }
  0x19   : > { %p606_p5 = pnand %p604_p4, %p601_p2 }
  0x1b   : > { %609 = shalt.err (!%p606_p5)
}
  0x1c   : > { %s610_s7 = scalar_lea.vmem %s144_s23, 512  ;;  %p618_p3 = scmp.lt.s32.totalorder %s144_s23, %s144_s23 }
  0x1d   : > { %p611_p6 = scmp.ne.s32.totalorder %s144_s23, %s610_s7  ;;  %p619_p7 = scmp.lt.s32.totalorder %s610_s7, %s610_s7 }
  0x1f   : > { %p613_p9 = pnand %p611_p6, %p599_p0  ;;  %p620_p8 = por %p619_p7, %p618_p3 }
  0x21   : > { %p614_p11 = pneg %p613_p9 }
  0x23   : > { %p621_p12 = pnand %p620_p8, %p614_p11 }
  0x25   : > { %624 = shalt.err (!%p621_p12)
}
  0x26   : > { %s742_s8 = smov 128   ;;  %s743_s9 = smov 8  }
  0x27   : > { %530 = dma.hbm_to_vmem [thread:$0]  (!%p826_p10), %s967_s1, 512, %s144_s23, [#allocation7], %s742_s8, %s742_s8, %s743_s9  }
  0x28   : > { %s27_s12 = sadd.s32 1, %s735_s16  ;;  %s160_s22 = sand.u32 1, %s727_s14  }
  0x29   : > { %p28_p3 = scmp.ge.s32.totalorder %s27_s12, 2  ;;  %s482_s27 = sshll.u32 %s160_s22, 6 }
  0x2a   : > { %s483_s28 = sshll.u32 %s735_s16, 7  ;;  %s164_s23 = scalar_lea.vmem [#allocation3], %s482_s27 }
  0x2b   : > { %s992_s12 = smov (%p28_p3, %s27_s12), 0  ;;  %s863_s24 = scalar_lea.hbm %s966_s0, %s483_s28 }
  0x2c   : > { %s35_s4 = ssub.s32 %s735_s16, %s992_s12  ;;  %s173_s5 = sshll.u32 %s164_s23, 4  ;;  %s867_s5 = int_to_ptr.vmem [resolvable:$true] %s173_s5 }
  0x2d   : > { %p37_p7 = scmp.eq.s32.totalorder %s35_s4, 0  ;;  %s874_s7 = scalar_lea.sflag [#allocation4], %s160_s22 }
  0x2e   : > { %s625_s10 = scalar_lea.hbm %s863_s24, 1024  ;;  %p980_p10 = scmp.ne.s32.totalorder %s979_s26, 0 }
  0x2f   : > { %s872_s6 = scalar_select %p37_p7, %s727_s14, %s39_s25  }
  0x30   : > { %p626_p8 = scmp.ne.s32.totalorder %s863_s24, %s625_s10  ;;  %p627_p12 = pneg %p980_p10 }
  0x31   : > { %s630_s27 = scalar_lea.hbm %s966_s0, 2048  ;;  %p631_p1 = scmp.lt.u32.totalorder %s863_s24, %s966_s0 }
  0x32   : > { %p628_p13 = pnand %p627_p12, %p626_p8  ;;  %p632_p2 = scmp.lt.u32.totalorder %s630_s27, %s625_s10 }
  0x33   : > { %p634_p5 = scmp.lt.u32.totalorder %s625_s10, %s863_s24 }
  0x34   : > { %p629_p0 = pneg %p628_p13  ;;  %p633_p4 = por %p632_p2, %p631_p1 }
  0x36   : > { %p635_p6 = por %p634_p5, %p633_p4 }
  0x38   : > { %p636_p9 = pnand %p635_p6, %p629_p0 }
  0x3a   : > { %639 = shalt.err (!%p636_p9)
}
  0x3b   : > { %s640_s25 = scalar_lea.vmem %s867_s5, 1024  ;;  %s744_s22 = smov [#allocation3]  }
  0x3c   : > { %p641_p11 = scmp.ne.s32.totalorder %s867_s5, %s640_s25  ;;  %s645_s4 = sshll.u32 %s744_s22, 4  ;;  %s646_s4 = int_to_ptr.vmem [resolvable:$false] %s645_s4 }
  0x3d   : > { %s647_s23 = scalar_lea.vmem %s646_s4, 2048  ;;  %p648_p8 = scmp.lt.s32.totalorder %s867_s5, %s646_s4 }
  0x3e   : > { %p643_p3 = pnand %p641_p11, %p627_p12  ;;  %p649_p13 = scmp.lt.s32.totalorder %s647_s23, %s640_s25 }
  0x40   : > { %p644_p7 = pneg %p643_p3  ;;  %p650_p1 = por %p649_p13, %p648_p8 }
  0x42   : > { %p651_p2 = pnand %p650_p1, %p644_p7 }
  0x44   : > { %654 = shalt.err (!%p651_p2)
}
  0x45   : > { %s745_s10 = smov 256   ;;  %p981_p12 = scmp.ne.s32.totalorder %s977_s21, 0 }
  0x46   : > { %534 = dma.hbm_to_vmem [thread:$0]  (!%p980_p10), %s863_s24, 1024, %s867_s5, %s874_s7, %s745_s10, %s742_s8, %s743_s9  }
  0x47   : > { %185 = sbr.rel (%p981_p12) target bundleno = 501 (0x1f5), region = 32  ;;  %s187_s11 = sand.u32 (!%p981_p12), 1, %s723_s13  }
  0x48   : > { %s485_s28 = sshll.u32 (!%p981_p12), %s187_s11, 6  ;;  %s188_s27 = scalar_lea.sflag (!%p981_p12), [#allocation4], %s187_s11 }
  0x49   : > { %s191_s29 = scalar_lea.vmem (!%p981_p12), [#allocation3], %s485_s28  ;;  %p982_p0 = scmp.ne.s32.totalorder (!%p981_p12), %s976_s20, 0 }
  0x4e   : > { %706 = dma.done.wait (%p982_p0), %s188_s27, 1024  }
  0x4f   : > { %708 = vsyncadd (%p982_p0), %s188_s27, 4294966272  ;;  %p983_p4 = scmp.ne.s32.totalorder %s975_s19, 0 }
  0x51   : > { %710 = dma.done.wait (%p983_p4), [#allocation7], 512  }
  0x52   : > { %712 = vsyncadd (%p983_p4), [#allocation7], 4294966784  ;;  %p487_p10 = scmp.ne.s32.totalorder %s731_s15, 0 }
  0x53   : > { %vm218_vm0 = vcmask (!%p487_p10), 254976   ;;  %v746_v0 = vmov (!%p487_p10), 0.0  }
  0x54   : > { %217 = sbr.rel (%p487_p10) target bundleno = 91 (0x5b), region = 44  ;;  %219 = vst.msk [vmem:[#allocation2] sm:$0x3] (!%p487_p10), %vm218_vm0, %v746_v0 }
  0x5b PF: > { %v225_v1 = vld [vmem:[%s191_s29 + $0x20] sm:$0xff]  ;;  %v226_v3 = vld [vmem:[%s191_s29 + $0x28] sm:$0xff]  ;;  %v227_v5 = vld [vmem:[%s191_s29 + $0x30] sm:$0xff]  ;;  %v253_v9 = vlaneseq  ;;  %vm264_vm1 = vcmask 130112   ;;  %vm271_vm2 = vcmask 195712   ;;  %vm278_vm3 = vcmask 261312  }
  0x5c   : > { %v221_v2 = vld [vmem:[%s191_s29] sm:$0xff]  ;;  %237 = vadd.xlane.f32.xlu1 %v225_v1  ;;  %v222_v4 = vld [vmem:[%s191_s29 + $0x8] sm:$0xff]  ;;  %v223_v6 = vld [vmem:[%s191_s29 + $0x10] sm:$0xff]  ;;  %vm299_vm4 = vcmask 1041409   ;;  %vm303_vm5 = vcmask 254976   ;;  %p488_p5 = scmp.ne.s32.totalorder %s731_s15, 1 }
  0x5d   : > { %229 = vadd.xlane.f32.xlu0 %v221_v2  ;;  %v228_v7 = vld [vmem:[%s191_s29 + $0x38] sm:$0xff]  ;;  %v254_v10 = vand.u32 127, %v253_v9  ;;  %v256_v15 = vshrl.u32 %v253_v9, 7  ;;  %v310_v44 = vld [vmem:[#allocation6] sm:$0xff] (!%p488_p5)  ;;  %v311_v45 = vld [vmem:[#allocation6 + $0x8] sm:$0xff] (!%p488_p5)  ;;  %v747_v47 = vmov (!%p488_p5), 0.0|0.0  }
  0x5e   : > { %v224_v8 = vld [vmem:[%s191_s29 + $0x18] sm:$0xff]  ;;  %v312_v46 = vld [vmem:[#allocation6 + $0x10] sm:$0xff] (!%p488_p5)  ;;  %511 = vmatprep.subr.bf16.mxu0 (!%p488_p5), %v747_v47  ;;  %v512_v48 = vpack.c.bf16 (!%p488_p5), %v311_v45, %v310_v44  ;;  %vm748_vm6 = vmmov (!%p488_p5), 0   ;;  %v749_v50 = vmov (!%p488_p5), 0.0   ;;  %vm321_vm7 = vcmask (!%p488_p5), 261120  }
  0x5f   : > { %v259_v13 = vadd.s32 4294967288, %v254_v10  ;;  %v266_v14 = vadd.s32 4294967280, %v254_v10  ;;  %v273_v19 = vadd.s32 4294967272, %v254_v10  ;;  %v257_v21 = vsub.s32 %v254_v10, %v256_v15  ;;  %v220_v39 = vld [vmem:[#allocation2] sm:$0x3]  ;;  %508 = vmatprep.mubr.msk.f32.mxu0 (!%p488_p5), %vm748_vm6, %v749_v50 }
  0x60   : > { %239 = vadd.xlane.f32.xlu1 %v226_v3  ;;  %v313_v49 = vld [vmem:[#allocation6 + $0x18] sm:$0xff] (!%p488_p5)  ;;  %513 = vmatpush3.bf16.msra.mxu0 (!%p488_p5), %v512_v48 }
  0x61   : > { %231 = vadd.xlane.f32.xlu0 %v222_v4  ;;  %v262_v18 = vsub.s32 %v259_v13, %v256_v15  ;;  %v269_v20 = vsub.s32 %v266_v14, %v256_v15  ;;  %v276_v26 = vsub.s32 %v273_v19, %v256_v15  ;;  %v515_v51 = vpack.c.bf16 (!%p488_p5), %v313_v49, %v312_v46  ;;  %v489_v53 = vld [vmem:[%s968_s2] ss:$0 sm:$0xff] (!%p488_p5) }
  0x62   : > { %514 = vmatprep.subr.bf16.mxu0 (!%p488_p5), %v747_v47 }
  0x64   : > { %241 = vadd.xlane.f32.xlu1 %v227_v5  ;;  %516 = vmatpush3.bf16.msra.mxu0 (!%p488_p5), %v515_v51 }
  0x65   : > { %233 = vadd.xlane.f32.xlu0 %v223_v6 }
  0x68   : > { %243 = vadd.xlane.f32.xlu1 %v228_v7 }
  0x69   : > { %235 = vadd.xlane.f32.xlu0 %v224_v8 }
  0xe9   : > { %v238_v11 = vpop.xlane.xlu1 %237 }
  0xea   : > { %v230_v12 = vpop.xlane.xlu0 %229  ;;  %v283_v29 = vrot.slane %v238_v11, %v257_v21 }
  0xeb   : > { %v258_v30 = vrot.slane %v230_v12, %v257_v21 }
  0xed   : > { %v240_v16 = vpop.xlane.xlu1 %239 }
  0xee   : > { %v232_v17 = vpop.xlane.xlu0 %231  ;;  %v287_v24 = vrot.slane %v240_v16, %v262_v18 }
  0xef   : > { %v263_v25 = vrot.slane %v232_v17, %v262_v18 }
  0xf0   : > { %v288_v33 = vsel %vm264_vm1, %v287_v24, %v283_v29 }
  0xf1   : > { %v242_v22 = vpop.xlane.xlu1 %241  ;;  %v265_v34 = vsel %vm264_vm1, %v263_v25, %v258_v30 }
  0xf2   : > { %v234_v23 = vpop.xlane.xlu0 %233  ;;  %v292_v27 = vrot.slane %v242_v22, %v269_v20 }
  0xf3   : > { %v270_v28 = vrot.slane %v234_v23, %v269_v20 }
  0xf4   : > { %v293_v37 = vsel %vm271_vm2, %v292_v27, %v288_v33 }
  0xf5   : > { %v244_v31 = vpop.xlane.xlu1 %243  ;;  %v272_v38 = vsel %vm271_vm2, %v270_v28, %v265_v34 }
  0xf6   : > { %v236_v32 = vpop.xlane.xlu0 %235  ;;  %v297_v35 = vrot.slane %v244_v31, %v276_v26 }
  0xf7   : > { %v277_v36 = vrot.slane %v236_v32, %v276_v26  ;;  %308 = sbr.rel (%p488_p5) target bundleno = 476 (0x1dc), region = 48 }
  0xf8   : > { %v298_v40 = vsel %vm278_vm3, %v297_v35, %v293_v37 }
  0xf9   : > { %v279_v41 = vsel %vm278_vm3, %v277_v36, %v272_v38 }
  0xfa   : > { %v300_v42 = vsel %vm299_vm4, %v298_v40, %v279_v41 }
  0xfb   : > { %v302_v43 = vadd.f32 %v300_v42, %v220_v39 }
  0xfd   : > { %304 = vst.msk [vmem:[#allocation2] sm:$0x3] %vm303_vm5, %v302_v43 }
 0x104   : > { %v309_v52 = vld [vmem:[#allocation2] sm:$0x3] }
 0x105   : > { %509 = vmatmul.mubr.msk.f32.vlgmr.msra.gmra.mrb[0].mxu0 %vm321_vm7, %v309_v52 }
 0x1d8   : > { %v391_v54 = vpop.f32.mrb[0].mxu0 }
 0x1d9   : > { %v392_v55 = vadd.f32 %v489_v53, %v391_v54  ;;  %v510_v56 = vpop.f32.mrb[1].mxu0 }
 0x1db   : > { %395 = vst [vmem:[#allocation8] sm:$0x3] %v392_v55 }
 0x1dc PF: > { %p922_p6 = scmp.eq.s32.totalorder %s478_s18, 1  ;;  %s750_s21 = smov [#allocation8]  }
 0x1dd   : > { %s405_s26 = sshll.u32 %s750_s21, 4  ;;  %s406_s26 = int_to_ptr.vmem [resolvable:$true] %s405_s26 }
 0x1de   : > { %s655_s8 = scalar_lea.vmem %s406_s26, 32  ;;  %p662_p7 = scmp.lt.s32.totalorder %s406_s26, %s406_s26 }
 0x1df   : > { %p656_p9 = scmp.ne.s32.totalorder %s406_s26, %s655_s8  ;;  %p663_p8 = scmp.lt.s32.totalorder %s655_s8, %s655_s8 }
 0x1e1   : > { %p657_p11 = pnand %p656_p9, %p922_p6  ;;  %p664_p13 = por %p663_p8, %p662_p7 }
 0x1e3   : > { %p658_p3 = pneg %p657_p11 }
 0x1e5   : > { %p665_p1 = pnand %p664_p13, %p658_p3 }
 0x1e7   : > { %668 = shalt.err (!%p665_p1)
}
 0x1e8   : > { %s669_s18 = scalar_lea.hbm %s969_s3, 32 }
 0x1e9   : > { %p670_p2 = scmp.ne.s32.totalorder %s969_s3, %s669_s18  ;;  %p675_p4 = scmp.lt.u32.totalorder %s669_s18, %s969_s3 }
 0x1eb   : > { %p671_p12 = pnand %p670_p2, %p922_p6 }
 0x1ed   : > { %p672_p0 = pneg %p671_p12 }
 0x1ef   : > { %p677_p10 = pnand %p675_p4, %p672_p0 }
 0x1f1   : > { %680 = shalt.err (!%p677_p10)
}
 0x1f2   : > { %524 = dma.vmem_to_hbm [thread:$0]  (%p922_p6), %s406_s26, 32, %s969_s3, [#allocation5]  }
 0x1f3   : > { %714 = dma.done.wait (%p922_p6), [#allocation5], 32  }
 0x1f4   : > { %716 = vsyncadd (%p922_p6), [#allocation5], 4294967264 }
 0x1f5 PF: > { %s18_s17 = sadd.s32 1, %s739_s17   ;;  %s985_s23 = smov %s992_s12 }
 0x1f6   : > { %p15_p5 = scmp.ge.s32.totalorder %s18_s17, 4   ;;  %s986_s12 = smov %s723_s13 }
 0x1f7   : > { %s987_s13 = smov %s727_s14  ;;  %s988_s14 = smov %s872_s6 }
 0x1f8   : > { %s989_s15 = smov %s735_s16  ;;  %s990_s16 = smov %s985_s23 }
 0x1f9   :  { %17 = sbr.rel (!%p15_p5) target bundleno = 6 (0x6), region = 82 }
 0x200   :  { %418 = vsyncpa [#allocation4], 1 }
 0x201   :  { %420 = vsyncpa [#allocation4 + $0x1], 1 }
 0x202   :  { %421 = vsyncpa [#allocation7], 1 }
 0x203   :  { %422 = vsyncpa [#allocation5], 1 }
 0x204   :  { %424 = vsyncpa [#allocation5 + $0x1], 1 }

</bundles_post_ra>
